<compile_context>
chip_gen: v6e
topology: v6e:2x2x1
jax: 0.10.0
libtpu: 0.0.40
codegen_flags: <defaults>
</compile_context>

<pallas_src>
import numpy as np
import jax
import jax.numpy as jnp
from jax.experimental import pallas as pl
from jax.experimental.pallas import tpu as pltpu


def _ficnn_kernel(yT_ref,                         # (in_dim, tb)  batch on lanes
                  wy0_ref, by0_ref,               # (hidden, in_dim), (hidden, 1)
                  wy1_ref, by1_ref,
                  wy2_ref, by2_ref,
                  wy3_ref, by3_ref,               # (out_dim, in_dim), (out_dim, 1)
                  wz0_ref, wz1_ref,               # (hidden, hidden)  softplus'd
                  wz2_ref,                        # (out_dim, hidden) softplus'd
                  o_ref):                         # (out_dim, tb)  lane-dense out
    yT = yT_ref[...]

    # z = Wy[0](y)                                      -> (hidden, tb)
    z = (jnp.dot(wy0_ref[...], yT, preferred_element_type=jnp.float32)
         + by0_ref[...])

    # hidden layer 1: z = relu(softplus(Wz0) z + Wy1 y + b1)
    z = jnp.maximum(
        jnp.dot(wz0_ref[...], z, preferred_element_type=jnp.float32)
        + jnp.dot(wy1_ref[...], yT, preferred_element_type=jnp.float32)
        + by1_ref[...], 0.0)

    # hidden layer 2
    z = jnp.maximum(
        jnp.dot(wz1_ref[...], z, preferred_element_type=jnp.float32)
        + jnp.dot(wy2_ref[...], yT, preferred_element_type=jnp.float32)
        + by2_ref[...], 0.0)

    # output layer: z = softplus(Wz2) z + Wy3 y + b3     -> (out_dim, tb)
    z = (jnp.dot(wz2_ref[...], z, preferred_element_type=jnp.float32)
         + jnp.dot(wy3_ref[...], yT, preferred_element_type=jnp.float32)
         + by3_ref[...])

    o_ref[...] = jax.nn.sigmoid(z).astype(o_ref.dtype)


def ficnn_forward(y, params, *, tb_max=65536, y_transposed=False):
    """FICNN forward.

    y: (B, in_dim) float32, or (in_dim, B) if y_transposed=True (preferred for
       large B: avoids the extra HBM pass of the wrapper-side transpose).
    Returns (B,) for out_dim == 1 (matching sigmoid(z.squeeze(-1))), else
    (B, out_dim).
    """
    if y_transposed:
        in_dim, B = y.shape
        yT = y.astype(jnp.float32)
    else:
        B, in_dim = y.shape
        yT = y.astype(jnp.float32).T   # one transpose copy; negligible vs kernel
    hidden = params["wy0"].shape[0]
    out_dim = params["wy3"].shape[0]

    # --- hoisted parameter preprocessing (runs once, outside the kernel) ----
    wz0 = jax.nn.softplus(params["wz0"]).astype(jnp.float32)
    wz1 = jax.nn.softplus(params["wz1"]).astype(jnp.float32)
    wz2 = jax.nn.softplus(params["wz2"]).astype(jnp.float32)
    wy0 = params["wy0"].astype(jnp.float32)
    wy1 = params["wy1"].astype(jnp.float32)
    wy2 = params["wy2"].astype(jnp.float32)
    wy3 = params["wy3"].astype(jnp.float32)
    by0 = params["by0"].astype(jnp.float32).reshape(hidden, 1)
    by1 = params["by1"].astype(jnp.float32).reshape(hidden, 1)
    by2 = params["by2"].astype(jnp.float32).reshape(hidden, 1)
    by3 = params["by3"].astype(jnp.float32).reshape(out_dim, 1)

    # --- batch-on-lanes tiling: big lane-dense tiles, ragged last block -----
    # tb sized from B so that large B runs >= 2 grid steps (v7x megacore),
    # capped so VMEM fits all generations under the explicit limit below.
    tb_max = max(128, (int(tb_max) // 128) * 128)
    tb = min(tb_max, max(128, ((-(-B // 2) + 127) // 128) * 128))
    grid = (pl.cdiv(B, tb),)

    # Constant weights/biases: whole array, same block every step (tiny: each
    # pads to one (8,128) tile).  pipeline_mode=pl.Buffered(1) would shave the
    # redundant double buffer but only matters if hidden_dim is scaled up.
    def w_spec(a):
        return pl.BlockSpec(a.shape, lambda i: (0, 0))

    out = pl.pallas_call(
        _ficnn_kernel,
        out_shape=jax.ShapeDtypeStruct((out_dim, B), jnp.float32),
        grid_spec=pltpu.PrefetchScalarGridSpec(
            num_scalar_prefetch=0,
            grid=grid,
            in_specs=[
                pl.BlockSpec((in_dim, tb), lambda i: (0, i)),   # y^T tile
                w_spec(wy0), w_spec(by0),
                w_spec(wy1), w_spec(by1),
                w_spec(wy2), w_spec(by2),
                w_spec(wy3), w_spec(by3),
                w_spec(wz0), w_spec(wz1), w_spec(wz2),
            ],
            out_specs=pl.BlockSpec((out_dim, tb), lambda i: (0, i)),
        ),
        compiler_params=pltpu.CompilerParams(
            dimension_semantics=("parallel",),
            vmem_limit_bytes=48 * 1024 * 1024),
    )(yT, wy0, by0, wy1, by1, wy2, by2, wy3, by3, wz0, wz1, wz2)

    if out_dim == 1:
        return out[0]                 # matches z.squeeze(-1) in the torch module
    return out.T


def make_params(key, in_dim=2, hidden_dim=8, out_dim=1):
    """Deterministic PyTorch-Linear-style init (uniform +/- 1/sqrt(fan_in)).

    Weights are in PyTorch layout (out_features, in_features).  Wz weights are
    stored RAW (pre-softplus), as in the parametrized torch module.
    """
    def linear(key, fan_in, fan_out, bias=True):
        kw, kb = jax.random.split(key)
        bound = 1.0 / np.sqrt(fan_in)
        w = jax.random.uniform(kw, (fan_out, fan_in), jnp.float32, -bound, bound)
        b = (jax.random.uniform(kb, (fan_out,), jnp.float32, -bound, bound)
             if bias else None)
        return w, b

    keys = jax.random.split(key, 7)
    wy0, by0 = linear(keys[0], in_dim, hidden_dim)
    wy1, by1 = linear(keys[1], in_dim, hidden_dim)
    wy2, by2 = linear(keys[2], in_dim, hidden_dim)
    wy3, by3 = linear(keys[3], in_dim, out_dim)
    wz0, _ = linear(keys[4], hidden_dim, hidden_dim, bias=False)
    wz1, _ = linear(keys[5], hidden_dim, hidden_dim, bias=False)
    wz2, _ = linear(keys[6], hidden_dim, out_dim, bias=False)
    return dict(wy0=wy0, by0=by0, wy1=wy1, by1=by1, wy2=wy2, by2=by2,
                wy3=wy3, by3=by3, wz0=wz0, wz1=wz1, wz2=wz2)


def ficnn_reference(y, p):
    """Pure-JAX reference matching the PyTorch FICNN forward (n_layers=4)."""
    sp = jax.nn.softplus
    z = y @ p["wy0"].T + p["by0"]
    z = jax.nn.relu(z @ sp(p["wz0"]).T + y @ p["wy1"].T + p["by1"])
    z = jax.nn.relu(z @ sp(p["wz1"]).T + y @ p["wy2"].T + p["by2"])
    z = z @ sp(p["wz2"]).T + y @ p["wy3"].T + p["by3"]
    return jax.nn.sigmoid(z.squeeze(-1))


if __name__ == "__main__":
    in_dim, hidden_dim, out_dim = 2, 8, 1

    key = jax.random.PRNGKey(0)
    k_params, k_y1, k_y2 = jax.random.split(key, 3)
    params = make_params(k_params, in_dim, hidden_dim, out_dim)

    # Small batch, batch-major input path (single partial tile).
    batch = 16
    y = jax.random.normal(k_y1, (batch, in_dim), jnp.float32)
    out = jax.block_until_ready(ficnn_forward(y, params))
    ref = ficnn_reference(y, params)
    np.testing.assert_allclose(np.asarray(out), np.asarray(ref),
                               rtol=1e-5, atol=1e-5)
    assert out.shape == (batch,)

    # Non-multiple-of-128 batch through the zero-extra-copy transposed path
    # (exercises ragged last-block masking and the 2-step grid).
    batch2 = 300
    y2 = jax.random.normal(k_y2, (batch2, in_dim), jnp.float32)
    out2 = jax.block_until_ready(
        ficnn_forward(jnp.asarray(y2).T, params, y_transposed=True))
    ref2 = ficnn_reference(y2, params)
    np.testing.assert_allclose(np.asarray(out2), np.asarray(ref2),
                               rtol=1e-5, atol=1e-5)
    assert out2.shape == (batch2,)

    print("KERNEL_OK")
</pallas_src>

<mosaic_0001>
module attributes {stable_mosaic.version = 11 : i64} {
  func.func @_ficnn_kernel(%arg0: i32, %arg1: memref<2x128xf32, #tpu.memory_space<vmem>>, %arg2: memref<8x2xf32, #tpu.memory_space<vmem>>, %arg3: memref<8x1xf32, #tpu.memory_space<vmem>>, %arg4: memref<8x2xf32, #tpu.memory_space<vmem>>, %arg5: memref<8x1xf32, #tpu.memory_space<vmem>>, %arg6: memref<8x2xf32, #tpu.memory_space<vmem>>, %arg7: memref<8x1xf32, #tpu.memory_space<vmem>>, %arg8: memref<1x2xf32, #tpu.memory_space<vmem>>, %arg9: memref<1x1xf32, #tpu.memory_space<vmem>>, %arg10: memref<8x8xf32, #tpu.memory_space<vmem>>, %arg11: memref<8x8xf32, #tpu.memory_space<vmem>>, %arg12: memref<1x8xf32, #tpu.memory_space<vmem>>, %arg13: memref<1x128xf32, #tpu.memory_space<vmem>>) attributes {dimension_semantics = [#tpu.dimension_semantics<parallel>], iteration_bounds = array<i64: 1>, scalar_prefetch = 0 : i64, scratch_operands = 0 : i64, tpu.core_type = #tpu.core_type<tc>, window_params = [{transform_indices = @transform_0, window_bounds = array<i64: 2, 128>}, {pipeline_mode = #tpu.pipeline_mode<synchronous>, transform_indices = @transform_1, window_bounds = array<i64: 8, 2>}, {pipeline_mode = #tpu.pipeline_mode<synchronous>, transform_indices = @transform_2, window_bounds = array<i64: 8, 1>}, {pipeline_mode = #tpu.pipeline_mode<synchronous>, transform_indices = @transform_3, window_bounds = array<i64: 8, 2>}, {pipeline_mode = #tpu.pipeline_mode<synchronous>, transform_indices = @transform_4, window_bounds = array<i64: 8, 1>}, {pipeline_mode = #tpu.pipeline_mode<synchronous>, transform_indices = @transform_5, window_bounds = array<i64: 8, 2>}, {pipeline_mode = #tpu.pipeline_mode<synchronous>, transform_indices = @transform_6, window_bounds = array<i64: 8, 1>}, {pipeline_mode = #tpu.pipeline_mode<synchronous>, transform_indices = @transform_7, window_bounds = array<i64: 1, 2>}, {pipeline_mode = #tpu.pipeline_mode<synchronous>, transform_indices = @transform_8, window_bounds = array<i64: 1, 1>}, {pipeline_mode = #tpu.pipeline_mode<synchronous>, transform_indices = @transform_9, window_bounds = array<i64: 8, 8>}, {pipeline_mode = #tpu.pipeline_mode<synchronous>, transform_indices = @transform_10, window_bounds = array<i64: 8, 8>}, {pipeline_mode = #tpu.pipeline_mode<synchronous>, transform_indices = @transform_11, window_bounds = array<i64: 1, 8>}, {transform_indices = @transform_12, window_bounds = array<i64: 1, 128>}]} {
    %c0 = arith.constant 0 : index
    %c0_0 = arith.constant 0 : index
    %0 = vector.load %arg1[%c0, %c0_0] : memref<2x128xf32, #tpu.memory_space<vmem>>, vector<2x128xf32>
    %c0_1 = arith.constant 0 : index
    %c0_2 = arith.constant 0 : index
    %1 = vector.load %arg2[%c0_1, %c0_2] : memref<8x2xf32, #tpu.memory_space<vmem>>, vector<8x2xf32>
    %cst = arith.constant dense<0.000000e+00> : vector<8x128xf32>
    %2 = tpu.matmul %1, %0, %cst {dimension_numbers = #tpu.dot_dimension_numbers<[1], [0], [0], [1], [0, 0, 1, 1], [], []>} : vector<8x2xf32>, vector<2x128xf32>, vector<8x128xf32> -> vector<8x128xf32>
    %c0_3 = arith.constant 0 : index
    %c0_4 = arith.constant 0 : index
    %3 = vector.load %arg3[%c0_3, %c0_4] : memref<8x1xf32, #tpu.memory_space<vmem>>, vector<8x1xf32>
    %4 = vector.broadcast %3 : vector<8x1xf32> to vector<8x128xf32>
    %5 = arith.addf %2, %4 : vector<8x128xf32>
    %c0_5 = arith.constant 0 : index
    %c0_6 = arith.constant 0 : index
    %6 = vector.load %arg10[%c0_5, %c0_6] : memref<8x8xf32, #tpu.memory_space<vmem>>, vector<8x8xf32>
    %cst_7 = arith.constant dense<0.000000e+00> : vector<8x128xf32>
    %7 = tpu.matmul %6, %5, %cst_7 {dimension_numbers = #tpu.dot_dimension_numbers<[1], [0], [0], [1], [0, 0, 1, 1], [], []>} : vector<8x8xf32>, vector<8x128xf32>, vector<8x128xf32> -> vector<8x128xf32>
    %c0_8 = arith.constant 0 : index
    %c0_9 = arith.constant 0 : index
    %8 = vector.load %arg4[%c0_8, %c0_9] : memref<8x2xf32, #tpu.memory_space<vmem>>, vector<8x2xf32>
    %cst_10 = arith.constant dense<0.000000e+00> : vector<8x128xf32>
    %9 = tpu.matmul %8, %0, %cst_10 {dimension_numbers = #tpu.dot_dimension_numbers<[1], [0], [0], [1], [0, 0, 1, 1], [], []>} : vector<8x2xf32>, vector<2x128xf32>, vector<8x128xf32> -> vector<8x128xf32>
    %10 = arith.addf %7, %9 : vector<8x128xf32>
    %c0_11 = arith.constant 0 : index
    %c0_12 = arith.constant 0 : index
    %11 = vector.load %arg5[%c0_11, %c0_12] : memref<8x1xf32, #tpu.memory_space<vmem>>, vector<8x1xf32>
    %12 = vector.broadcast %11 : vector<8x1xf32> to vector<8x128xf32>
    %13 = arith.addf %10, %12 : vector<8x128xf32>
    %cst_13 = arith.constant 0.000000e+00 : f32
    %14 = vector.broadcast %cst_13 : f32 to vector<8x128xf32>
    %15 = arith.maximumf %13, %14 : vector<8x128xf32>
    %c0_14 = arith.constant 0 : index
    %c0_15 = arith.constant 0 : index
    %16 = vector.load %arg11[%c0_14, %c0_15] : memref<8x8xf32, #tpu.memory_space<vmem>>, vector<8x8xf32>
    %cst_16 = arith.constant dense<0.000000e+00> : vector<8x128xf32>
    %17 = tpu.matmul %16, %15, %cst_16 {dimension_numbers = #tpu.dot_dimension_numbers<[1], [0], [0], [1], [0, 0, 1, 1], [], []>} : vector<8x8xf32>, vector<8x128xf32>, vector<8x128xf32> -> vector<8x128xf32>
    %c0_17 = arith.constant 0 : index
    %c0_18 = arith.constant 0 : index
    %18 = vector.load %arg6[%c0_17, %c0_18] : memref<8x2xf32, #tpu.memory_space<vmem>>, vector<8x2xf32>
    %cst_19 = arith.constant dense<0.000000e+00> : vector<8x128xf32>
    %19 = tpu.matmul %18, %0, %cst_19 {dimension_numbers = #tpu.dot_dimension_numbers<[1], [0], [0], [1], [0, 0, 1, 1], [], []>} : vector<8x2xf32>, vector<2x128xf32>, vector<8x128xf32> -> vector<8x128xf32>
    %20 = arith.addf %17, %19 : vector<8x128xf32>
    %c0_20 = arith.constant 0 : index
    %c0_21 = arith.constant 0 : index
    %21 = vector.load %arg7[%c0_20, %c0_21] : memref<8x1xf32, #tpu.memory_space<vmem>>, vector<8x1xf32>
    %22 = vector.broadcast %21 : vector<8x1xf32> to vector<8x128xf32>
    %23 = arith.addf %20, %22 : vector<8x128xf32>
    %cst_22 = arith.constant 0.000000e+00 : f32
    %24 = vector.broadcast %cst_22 : f32 to vector<8x128xf32>
    %25 = arith.maximumf %23, %24 : vector<8x128xf32>
    %c0_23 = arith.constant 0 : index
    %c0_24 = arith.constant 0 : index
    %26 = vector.load %arg12[%c0_23, %c0_24] : memref<1x8xf32, #tpu.memory_space<vmem>>, vector<1x8xf32>
    %cst_25 = arith.constant dense<0.000000e+00> : vector<1x128xf32>
    %27 = tpu.matmul %26, %25, %cst_25 {dimension_numbers = #tpu.dot_dimension_numbers<[1], [0], [0], [1], [0, 0, 1, 1], [], []>} : vector<1x8xf32>, vector<8x128xf32>, vector<1x128xf32> -> vector<1x128xf32>
    %c0_26 = arith.constant 0 : index
    %c0_27 = arith.constant 0 : index
    %28 = vector.load %arg8[%c0_26, %c0_27] : memref<1x2xf32, #tpu.memory_space<vmem>>, vector<1x2xf32>
    %cst_28 = arith.constant dense<0.000000e+00> : vector<1x128xf32>
    %29 = tpu.matmul %28, %0, %cst_28 {dimension_numbers = #tpu.dot_dimension_numbers<[1], [0], [0], [1], [0, 0, 1, 1], [], []>} : vector<1x2xf32>, vector<2x128xf32>, vector<1x128xf32> -> vector<1x128xf32>
    %30 = arith.addf %27, %29 : vector<1x128xf32>
    %c0_29 = arith.constant 0 : index
    %c0_30 = arith.constant 0 : index
    %31 = vector.load %arg9[%c0_29, %c0_30] : memref<1x1xf32, #tpu.memory_space<vmem>>, vector<1x1xf32>
    %32 = vector.broadcast %31 : vector<1x1xf32> to vector<1x128xf32>
    %33 = arith.addf %30, %32 : vector<1x128xf32>
    %34 = arith.negf %33 : vector<1x128xf32>
    %35 = math.exp %34 : vector<1x128xf32>
    %cst_31 = arith.constant 1.000000e+00 : f32
    %36 = vector.broadcast %cst_31 : f32 to vector<1x128xf32>
    %37 = arith.addf %36, %35 : vector<1x128xf32>
    %38 = arith.divf %36, %37 : vector<1x128xf32>
    %c0_32 = arith.constant 0 : index
    %c0_33 = arith.constant 0 : index
    %39 = vector.load %arg13[%c0_32, %c0_33] : memref<1x128xf32, #tpu.memory_space<vmem>>, vector<1x128xf32>
    tpu.vector_store %arg13[%c0_32, %c0_33], %38 {strides = array<i32>} : memref<1x128xf32, #tpu.memory_space<vmem>>, vector<1x128xf32>,
    return
  }
  func.func @transform_0(%arg0: i32) -> (i32, i32) {
    %c0_i32 = arith.constant 0 : i32
    %c0_i32_0 = arith.constant 0 : i32
    return %c0_i32, %arg0 : i32, i32
  }
  func.func @transform_1(%arg0: i32) -> (i32, i32) {
    %c0_i32 = arith.constant 0 : i32
    %c0_i32_0 = arith.constant 0 : i32
    %c0_i32_1 = arith.constant 0 : i32
    return %c0_i32, %c0_i32_0 : i32, i32
  }
  func.func @transform_2(%arg0: i32) -> (i32, i32) {
    %c0_i32 = arith.constant 0 : i32
    %c0_i32_0 = arith.constant 0 : i32
    %c0_i32_1 = arith.constant 0 : i32
    return %c0_i32, %c0_i32_0 : i32, i32
  }
  func.func @transform_3(%arg0: i32) -> (i32, i32) {
    %c0_i32 = arith.constant 0 : i32
    %c0_i32_0 = arith.constant 0 : i32
    %c0_i32_1 = arith.constant 0 : i32
    return %c0_i32, %c0_i32_0 : i32, i32
  }
  func.func @transform_4(%arg0: i32) -> (i32, i32) {
    %c0_i32 = arith.constant 0 : i32
    %c0_i32_0 = arith.constant 0 : i32
    %c0_i32_1 = arith.constant 0 : i32
    return %c0_i32, %c0_i32_0 : i32, i32
  }
  func.func @transform_5(%arg0: i32) -> (i32, i32) {
    %c0_i32 = arith.constant 0 : i32
    %c0_i32_0 = arith.constant 0 : i32
    %c0_i32_1 = arith.constant 0 : i32
    return %c0_i32, %c0_i32_0 : i32, i32
  }
  func.func @transform_6(%arg0: i32) -> (i32, i32) {
    %c0_i32 = arith.constant 0 : i32
    %c0_i32_0 = arith.constant 0 : i32
    %c0_i32_1 = arith.constant 0 : i32
    return %c0_i32, %c0_i32_0 : i32, i32
  }
  func.func @transform_7(%arg0: i32) -> (i32, i32) {
    %c0_i32 = arith.constant 0 : i32
    %c0_i32_0 = arith.constant 0 : i32
    %c0_i32_1 = arith.constant 0 : i32
    return %c0_i32, %c0_i32_0 : i32, i32
  }
  func.func @transform_8(%arg0: i32) -> (i32, i32) {
    %c0_i32 = arith.constant 0 : i32
    %c0_i32_0 = arith.constant 0 : i32
    %c0_i32_1 = arith.constant 0 : i32
    return %c0_i32, %c0_i32_0 : i32, i32
  }
  func.func @transform_9(%arg0: i32) -> (i32, i32) {
    %c0_i32 = arith.constant 0 : i32
    %c0_i32_0 = arith.constant 0 : i32
    %c0_i32_1 = arith.constant 0 : i32
    return %c0_i32, %c0_i32_0 : i32, i32
  }
  func.func @transform_10(%arg0: i32) -> (i32, i32) {
    %c0_i32 = arith.constant 0 : i32
    %c0_i32_0 = arith.constant 0 : i32
    %c0_i32_1 = arith.constant 0 : i32
    return %c0_i32, %c0_i32_0 : i32, i32
  }
  func.func @transform_11(%arg0: i32) -> (i32, i32) {
    %c0_i32 = arith.constant 0 : i32
    %c0_i32_0 = arith.constant 0 : i32
    %c0_i32_1 = arith.constant 0 : i32
    return %c0_i32, %c0_i32_0 : i32, i32
  }
  func.func @transform_12(%arg0: i32) -> (i32, i32) {
    %c0_i32 = arith.constant 0 : i32
    %c0_i32_0 = arith.constant 0 : i32
    return %c0_i32, %arg0 : i32, i32
  }
}

</mosaic_0001>

<bundles_post_ra>
// kernel: tpu_custom_call.1
= control target key start
LH: loop header
LB: loop body
LE: loop exit
PB: predicated region body
PF: predicated region fallthrough
CT: control target
= control target key end

     0   :  { %s842_s0 = inlined_call_operand.vmem [shape: f32[2,16], index: 0, kind: input, shape index: {}]   ;;  %s843_s1 = inlined_call_operand.vmem [shape: f32[8,2], index: 1, kind: input, shape index: {}]   ;;  %s844_s2 = inlined_call_operand.vmem [shape: f32[8,1], index: 2, kind: input, shape index: {}]   ;;  %s845_s3 = inlined_call_operand.vmem [shape: f32[8,2], index: 3, kind: input, shape index: {}]   ;;  %s846_s4 = inlined_call_operand.vmem [shape: f32[8,1], index: 4, kind: input, shape index: {}]   ;;  %s847_s5 = inlined_call_operand.vmem [shape: f32[8,2], index: 5, kind: input, shape index: {}]   ;;  %s848_s6 = inlined_call_operand.vmem [shape: f32[8,1], index: 6, kind: input, shape index: {}]   ;;  %s849_s7 = inlined_call_operand.vmem [shape: f32[1,2], index: 7, kind: input, shape index: {}]   ;;  %s850_s8 = inlined_call_operand.<no memory space> [shape: f32[1,1], index: 8, kind: input, shape index: {}]   ;;  %s851_s9 = inlined_call_operand.vmem [shape: f32[8,8], index: 9, kind: input, shape index: {}]   ;;  %s852_s10 = inlined_call_operand.vmem [shape: f32[8,8], index: 10, kind: input, shape index: {}]   ;;  %s853_s11 = inlined_call_operand.vmem [shape: f32[1,8], index: 11, kind: input, shape index: {}]   ;;  %s854_s12 = inlined_call_operand.hbm [shape: f32[1,16], index: 12, kind: output, shape index: {}]  }
   0x1   :  { %v17_v0 = vstv %s850_s8 }
   0x2   :  { %18 = vst [vmem:[#allocation2] sm:$0x1] %v17_v0 }
   0x3   :  { %v44_v1 = vld [vmem:[%s842_s0] sm:$0x3]  ;;  %vm56_vm0 = vcmask 1041408   ;;  %v716_v3 = vmov 0.0   ;;  %vm717_vm1 = vmmov 0   ;;  %vm52_vm2 = vcmask 15360  }
   0x4   :  { %v45_v2 = vld [vmem:[%s843_s1] sm:$0xff]  ;;  %649 = vmatprep.subr.mxu0 %v716_v3  ;;  %651 = vmatprep.mubr.msk.f32.mxu0 %vm717_vm1, %v716_v3 }
   0x5   :  { %v46_v4 = vld [vmem:[%s844_s2] sm:$0xff] }
   0x6   :  { %19 = vsyncpa [#allocation4], 0  ;;  %650 = vmatpush3.msk.msra.mxu0 %vm56_vm0, %v44_v1  ;;  %v718_v5 = vmov 0   ;;  %v279_v6 = vld [vmem:[%s846_s4] sm:$0xff]  ;;  %654 = vmatprep.subr.mxu1 %v716_v3  ;;  %vm205_vm3 = vcmask 64512   ;;  %v597_v37 = vlaneseq }
   0x7   :  { %688 = vset.pattern.permute.xlu0 %v718_v5  ;;  %652 = vmatmul.mubr.msk.f32.vlgmr.msra.gmra.mxu0 %vm52_vm2, %v45_v2  ;;  %v131_v7 = vld [vmem:[%s845_s3] sm:$0xff] }
   0x8   :  { %49 = vperm.xlu0 %688, %v46_v4   ;;  %656 = vmatprep.mubr.msk.f32.mxu1 %vm717_vm1, %v716_v3  ;;  %v130_v11 = vld [vmem:[%s851_s9] sm:$0xff]  ;;  %v598_v38 = vshrl.u32 %v597_v37, 7 }
   0x9   :  { %655 = vmatpush3.msk.msra.mxu1 %vm56_vm0, %v44_v1  ;;  %659 = vmatprep.subr.mxu0 %v716_v3  ;;  %v288_v15 = vld [vmem:[%s847_s5] sm:$0xff] }
   0xa   :  { %661 = vmatprep.mubr.msk.f32.mxu0 %vm717_vm1, %v716_v3  ;;  %664 = vmatprep.subr.mxu1 %v716_v3  ;;  %v435_v16 = vld [vmem:[%s848_s6] sm:$0xff]  ;;  %v599_v39 = vsub.s32 0, %v598_v38 }
   0xb   :  { %689 = vset.pattern.permute.xlu1 %v718_v5  ;;  %657 = vmatmul.mubr.msk.f32.vlgmr.msra.gmra.mxu1 %vm52_vm2, %v131_v7  ;;  %v591_v17 = vld [vmem:[#allocation2] sm:$0x1] }
   0xc   :  { %282 = vperm.xlu0 %688, %v279_v6   ;;  %665 = vmatpush3.msk.msra.mxu1 %vm56_vm0, %v44_v1  ;;  %v287_v24 = vld [vmem:[%s852_s10] sm:$0xff] }
   0xd   :  { %666 = vmatprep.mubr.msk.f32.mxu1 %vm717_vm1, %v716_v3  ;;  %674 = vmatprep.subr.mxu1 %v716_v3  ;;  %v444_v27 = vld [vmem:[%s849_s7] sm:$0x1]  ;;  %s719_s7 = smov [#allocation3]  }
   0xe   :  { %438 = vperm.xlu1 %689, %v435_v16   ;;  %v443_v34 = vld [vmem:[%s853_s11] sm:$0x1]  ;;  %s615_s11 = sshll.u32 %s719_s7, 4  ;;  %s616_s11 = int_to_ptr.vmem [resolvable:$true] %s615_s11 }
   0xf   :  { %667 = vmatmul.mubr.msk.f32.vlgmr.msra.gmra.mxu1 %vm52_vm2, %v288_v15  ;;  %s694_s17 = scalar_lea.vmem %s616_s11, 16  ;;  %s698_s18 = scalar_lea.vmem %s616_s11, 32 }
  0x10   :  { %675 = vmatpush3.msk.msra.mxu1 %vm56_vm0, %v44_v1  ;;  %676 = vmatprep.mubr.msk.f32.mxu1 %vm717_vm1, %v716_v3  ;;  %p695_p0 = scmp.ne.s32.totalorder %s616_s11, %s694_s17  ;;  %p699_p1 = scmp.lt.s32.totalorder %s616_s11, %s616_s11 }
  0x11   :  { %p700_p2 = scmp.lt.s32.totalorder %s698_s18, %s694_s17 }
  0x12   :  { %594 = vperm.xlu1 %689, %v591_v17  }
  0x13   :  { %677 = vmatmul.mubr.msk.f32.vlgmr.msra.gmra.mxu1 %vm52_vm2, %v444_v27  ;;  %p701_p3 = por %p700_p2, %p699_p1 }
  0x15   :  { %p702_p4 = pnand %p701_p3, %p695_p0 }
  0x83   :  { %v50_v8 = vpop.permute.xlu0 %49 }
  0x87   :  { %v283_v20 = vpop.permute.xlu0 %282 }
  0x89   :  { %v439_v30 = vpop.permute.xlu1 %438 }
  0x8d   :  { %v595_v40 = vpop.permute.xlu1 %594 }
  0x8e   :  { %v600_v42 = vrot.slane %v595_v40, %v599_v39 }
  0xc7   :  { %v126_v9 = vpop.f32.mrf.mxu0 }
  0xc8   :  { %v127_v10 = vadd.f32 %v126_v9, %v50_v8 }
  0xc9   :  { %v653_v12 = vpop.f32.mrf.mxu0 }
  0xca   :  { %660 = vmatpush3.msra.mxu0 %v127_v10 }
  0xcb   :  { %662 = vmatmul.mubr.msk.f32.vlgmr.msra.gmra.mxu0 %vm205_vm3, %v130_v11  ;;  %669 = vmatprep.subr.mxu0 %v716_v3  ;;  %v201_v13 = vpop.f32.mrf.mxu1 }
  0xcc   :  { %671 = vmatprep.mubr.msk.f32.mxu0 %vm717_vm1, %v716_v3 }
  0xcd   :  { %v658_v14 = vpop.f32.mrf.mxu1 }
  0xcf   :  { %v358_v25 = vpop.f32.mrf.mxu1 }
  0xd1   :  { %v668_v26 = vpop.f32.mrf.mxu1 }
  0xd3   :  { %v514_v35 = vpop.f32.mrf.mxu1 }
  0xd5   :  { %v678_v36 = vpop.f32.mrf.mxu1 }
 0x18b   :  { %v275_v18 = vpop.f32.mrf.mxu0 }
 0x18c   :  { %v276_v19 = vadd.f32 %v275_v18, %v201_v13 }
 0x18d   :  { %v663_v21 = vpop.f32.mrf.mxu0 }
 0x18e   :  { %v285_v22 = vadd.f32 %v283_v20, %v276_v19 }
 0x190   :  { %v286_v23 = vmax.f32 %v285_v22, 0.0 }
 0x192   :  { %670 = vmatpush3.msra.mxu0 %v286_v23 }
 0x193   :  { %672 = vmatmul.mubr.msk.f32.vlgmr.msra.gmra.mxu0 %vm205_vm3, %v287_v24  ;;  %679 = vmatprep.subr.mxu0 %v716_v3 }
 0x194   :  { %681 = vmatprep.mubr.msk.f32.mxu0 %vm717_vm1, %v716_v3 }
 0x253   :  { %v431_v28 = vpop.f32.mrf.mxu0 }
 0x254   :  { %v432_v29 = vadd.f32 %v431_v28, %v358_v25 }
 0x255   :  { %v673_v31 = vpop.f32.mrf.mxu0 }
 0x256   :  { %v441_v32 = vadd.f32 %v439_v30, %v432_v29 }
 0x258   :  { %v442_v33 = vmax.f32 %v441_v32, 0.0 }
 0x25a   :  { %680 = vmatpush3.msra.mxu0 %v442_v33 }
 0x25b   :  { %682 = vmatmul.mubr.msk.f32.vlgmr.msra.gmra.mxu0 %vm205_vm3, %v443_v34 }
 0x31b   :  { %v587_v41 = vpop.f32.mrf.mxu0 }
 0x31c   :  { %v588_v43 = vadd.f32 %v587_v41, %v514_v35 }
 0x31d   :  { %v683_v44 = vpop.f32.mrf.mxu0 }
 0x31e   :  { %v601_v45 = vadd.f32 %v600_v42, %v588_v43 }
 0x320   :  { %v634_v46 = vmul.f32 -1.442695, %v601_v45 }
 0x322   :  { %690 = vpow2.f32 %v634_v46 }
 0x32f   :  { %v691_v47 = vpop.eup %690 }
 0x330   :  { %v605_v48 = vadd.f32 1.0, %v691_v47 }
 0x332   :  { %692 = vrcp.f32 %v605_v48 }
 0x33f   :  { %v693_v49 = vpop.eup %692 }
 0x340   :  { %608 = vst [vmem:[#allocation3] sm:$0x1] %v693_v49 }
 0x341   :  { %705 = shalt.err (!%p702_p4)
}
 0x342   :  { %618 = dma.vmem_to_hbm [thread:$0]  %s616_s11, 16, %s854_s12, [#allocation4]  }
 0x343   :  { %714 = dma.done.wait [#allocation4], 16  }
 0x344   :  { %715 = vsyncadd [#allocation4], 4294967280 }
 0x345   :  { %622 = vsyncpa [#allocation4], 1 }

</bundles_post_ra>
